<compile_context>
chip_gen: v6e
topology: v6e:2x2x1
jax: 0.10.0
libtpu: 0.0.40
codegen_flags: <defaults>
</compile_context>

<pallas_src>
import functools

import jax
import jax.numpy as jnp
from jax import lax
from jax.experimental import pallas as pl
from jax.experimental.pallas import tpu as pltpu


# ----------------------------- Pallas kernel ------------------------------- #
def _add_pert_kernel(idx_ref, img_ref, pert_ref, out_ref):
    # idx_ref : (1,) int32 in SMEM  (consumed by the perturbation index_map)
    # img_ref : (B, blk_f) block of the flattened image batch
    # pert_ref: (1, 1, blk_f) block of the selected perturbation row
    # out_ref : (B, blk_f)
    del idx_ref
    # pert_ref[0] -> (1, blk_f); sublane-broadcast add over the batch rows.
    out_ref[...] = (img_ref[...] + pert_ref[0]).astype(out_ref.dtype)


def _choose_block_f(batch: int, flat: int, itemsize: int = 4,
                    target_bytes: int = 2 * 1024 * 1024) -> int:
    """Pick a lane-dense column-tile width (multiple of 128, ~target_bytes per
    img block) or the full flattened width if it already fits."""
    max_elems = max(128, (target_bytes // (itemsize * batch)) // 128 * 128)
    if flat <= max_elems:
        return flat          # full dim -> always a legal block width
    return max_elems         # multiple of 128; remainder block handled by Pallas


def _add_perturbation_pallas(img_flat: jax.Array,
                             pert_flat: jax.Array,
                             idx: jax.Array) -> jax.Array:
    """img_flat: (B, F), pert_flat: (N, 1, F), idx: (1,) int32 -> (B, F)."""
    B, F = img_flat.shape
    blk_f = _choose_block_f(B, F, jnp.dtype(img_flat.dtype).itemsize)
    grid = (pl.cdiv(F, blk_f),)

    grid_spec = pltpu.PrefetchScalarGridSpec(
        num_scalar_prefetch=1,          # idx lands in SMEM, feeds the index_maps
        grid=grid,
        in_specs=[
            # full batch of rows, one lane-dense column tile per grid step
            pl.BlockSpec((B, blk_f), lambda j, idx_ref: (0, j)),
            # perturbation row selected directly in the DMA via the prefetched idx
            pl.BlockSpec((1, 1, blk_f), lambda j, idx_ref: (idx_ref[0], 0, j)),
        ],
        out_specs=pl.BlockSpec((B, blk_f), lambda j, idx_ref: (0, j)),
    )

    return pl.pallas_call(
        _add_pert_kernel,
        out_shape=jax.ShapeDtypeStruct((B, F), img_flat.dtype),
        grid_spec=grid_spec,
        compiler_params=pltpu.CompilerParams(
            dimension_semantics=("parallel",),     # tiles split across TCs on v7x
            vmem_limit_bytes=32 * 1024 * 1024,     # fits v5e/v6e/v7x comfortably
        ),
    )(idx, img_flat, pert_flat)


# ------------------------- Fully-traced forward ----------------------------- #
def _forward(img, pert_bank, key, *, p, static_idx):
    """Device-side forward: Bernoulli gate + perturbation add, no host syncs."""
    B, C, H, W = img.shape
    N = pert_bank.shape[0]
    F = C * H * W

    k_coin, k_idx = jax.random.split(key)
    coin = jax.random.uniform(k_coin, (), dtype=jnp.float32)
    if static_idx is None:
        idx = jax.random.randint(k_idx, (1,), 0, N, dtype=jnp.int32)
    else:
        idx = jnp.full((1,), static_idx, dtype=jnp.int32)

    # Lane-dense flattening (metadata-only reshapes, no HBM copies).
    img_flat = img.reshape(B, F)
    pert_flat = pert_bank.reshape(N, 1, F)

    applied = coin < jnp.float32(p)     # mirrors `torch.rand(1) >= p -> return img`
    out_flat = lax.cond(
        applied,
        lambda x: _add_perturbation_pallas(x, pert_flat, idx),
        lambda x: x,
        img_flat,
    )
    return out_flat.reshape(B, C, H, W), applied


# --------------------------- Module-equivalent ------------------------------ #
class AddImagePerturbation:
    """JAX/Pallas equivalent of the PyTorch AddImagePerturbation module."""

    def __init__(self, perturbation: jax.Array, p: float = 0.5, idx: int | None = None):
        self.perturbation = jnp.asarray(perturbation)   # (N, C, H, W)
        self.p = float(p)
        self.idx = idx
        self._fwd = jax.jit(
            functools.partial(_forward, p=self.p, static_idx=self.idx)
        )

    def __call__(self, img: jax.Array, key: jax.Array) -> jax.Array:
        out, applied = self._fwd(img, self.perturbation, key)
        # PyTorch squeezes the batch dim only on the perturbed path and only
        # when B == 1. That makes the output shape data-dependent, so a single
        # host read of the flag is unavoidable in the B == 1 case; the common
        # B > 1 path stays fully async.
        # TODO(synk): dynamic output shape (B==1 squeeze) cannot be expressed
        # inside a single jit; handled here with one scalar host read.
        if out.ndim == 4 and out.shape[0] == 1 and bool(applied):
            out = jnp.squeeze(out, axis=0)
        return out


# --------------------------------- Main ------------------------------------ #
if __name__ == "__main__":
    key = jax.random.PRNGKey(0)
    k_img, k_pert, k_call1, k_call2 = jax.random.split(key, 4)

    B, C, H, W = 2, 4, 16, 16
    N_PERT = 3

    img = jax.random.normal(k_img, (B, C, H, W), dtype=jnp.float32)
    perturbation = 0.1 * jax.random.normal(
        k_pert, (N_PERT, C, H, W), dtype=jnp.float32
    )

    # p=1.0 -> perturbation path always taken (exercises the Pallas kernel).
    module = AddImagePerturbation(perturbation, p=1.0, idx=1)
    out = jax.block_until_ready(module(img, k_call1))

    ref = img + perturbation[1][None, :, :, :]
    assert out.shape == (B, C, H, W)
    assert jnp.allclose(out, ref, atol=1e-6), "mismatch vs reference add"

    # p=0.0 -> identity path (lax.cond false branch), mirrors torch.rand(1) >= p.
    module_id = AddImagePerturbation(perturbation, p=0.0, idx=1)
    out_id = jax.block_until_ready(module_id(img, k_call2))
    assert out_id.shape == (B, C, H, W)
    assert jnp.array_equal(out_id, img)

    # Random-idx path (idx=None), still fully traced on device.
    module_rand = AddImagePerturbation(perturbation, p=1.0, idx=None)
    out_rand = jax.block_until_ready(module_rand(img, k_call2))
    assert out_rand.shape == (B, C, H, W)

    # batch==1 squeeze behaviour (perturbed path squeezes, identity path doesn't).
    img1 = img[:1]
    out1 = jax.block_until_ready(module(img1, k_call1))
    assert out1.shape == (C, H, W)
    out1_id = jax.block_until_ready(module_id(img1, k_call2))
    assert out1_id.shape == (1, C, H, W)

    print("KERNEL_OK")
</pallas_src>

<mosaic_0001>
module attributes {stable_mosaic.version = 11 : i64} {
  func.func @_add_pert_kernel(%arg0: i32, %arg1: memref<1xi32, #tpu.memory_space<smem>>, %arg2: memref<2x1024xf32, #tpu.memory_space<vmem>>, %arg3: memref<1x1x1024xf32, #tpu.memory_space<vmem>>, %arg4: memref<2x1024xf32, #tpu.memory_space<vmem>>) attributes {dimension_semantics = [#tpu.dimension_semantics<parallel>], iteration_bounds = array<i64: 1>, scalar_prefetch = 1 : i64, scratch_operands = 0 : i64, tpu.core_type = #tpu.core_type<tc>, window_params = [{transform_indices = @transform_0, window_bounds = array<i64: 2, 1024>}, {transform_indices = @transform_1, window_bounds = array<i64: 1, 1, 1024>}, {transform_indices = @transform_2, window_bounds = array<i64: 2, 1024>}]} {
    %c0 = arith.constant 0 : index
    %c0_0 = arith.constant 0 : index
    %0 = vector.load %arg2[%c0, %c0_0] : memref<2x1024xf32, #tpu.memory_space<vmem>>, vector<2x1024xf32>
    %c0_1 = arith.constant 0 : index
    %c0_2 = arith.constant 0 : index
    %c0_3 = arith.constant 0 : index
    %1 = vector.load %arg3[%c0_1, %c0_2, %c0_3] : memref<1x1x1024xf32, #tpu.memory_space<vmem>>, vector<1x1x1024xf32>
    %2 = vector.shape_cast %1 : vector<1x1x1024xf32> to vector<1x1024xf32>
    %3 = vector.broadcast %2 : vector<1x1024xf32> to vector<2x1024xf32>
    %4 = arith.addf %0, %3 : vector<2x1024xf32>
    %c0_4 = arith.constant 0 : index
    %c0_5 = arith.constant 0 : index
    %5 = vector.load %arg4[%c0_4, %c0_5] : memref<2x1024xf32, #tpu.memory_space<vmem>>, vector<2x1024xf32>
    tpu.vector_store %arg4[%c0_4, %c0_5], %4 {strides = array<i32>} : memref<2x1024xf32, #tpu.memory_space<vmem>>, vector<2x1024xf32>,
    return
  }
  func.func @transform_0(%arg0: i32, %arg1: memref<1xi32, #tpu.memory_space<smem>>) -> (i32, i32) {
    %c0_i32 = arith.constant 0 : i32
    %c0_i32_0 = arith.constant 0 : i32
    return %c0_i32, %arg0 : i32, i32
  }
  func.func @transform_1(%arg0: i32, %arg1: memref<1xi32, #tpu.memory_space<smem>>) -> (i32, i32, i32) {
    %c0 = arith.constant 0 : index
    %0 = memref.load %arg1[%c0] : memref<1xi32, #tpu.memory_space<smem>>
    %c0_i32 = arith.constant 0 : i32
    %c0_i32_0 = arith.constant 0 : i32
    return %0, %c0_i32, %arg0 : i32, i32, i32
  }
  func.func @transform_2(%arg0: i32, %arg1: memref<1xi32, #tpu.memory_space<smem>>) -> (i32, i32) {
    %c0_i32 = arith.constant 0 : i32
    %c0_i32_0 = arith.constant 0 : i32
    return %c0_i32, %arg0 : i32, i32
  }
}

</mosaic_0001>

<bundles_post_ra>
// kernel: branch_1_fun.1
= control target key start
LH: loop header
LB: loop body
LE: loop exit
PB: predicated region body
PF: predicated region fallthrough
CT: control target
= control target key end

     0   :  { %v34_v0 = vlaneseq  ;;  %v118_v1 = vmov 1983009808   ;;  %s160_s0 = inlined_call_operand.<no memory space> [shape: s32[1], index: 0, kind: input, shape index: {}]   ;;  %s161_s2 = inlined_call_operand.vmem [shape: f32[3,1,1024], index: 2, kind: input, shape index: {}]   ;;  %s162_s1 = inlined_call_operand.vmem [shape: f32[2,1024], index: 1, kind: input, shape index: {}]   ;;  %s163_s3 = inlined_call_operand.vmem [shape: f32[2,1024], index: 3, kind: output, shape index: {}]  }
   0x1   :  { %p25_p0 = scmp.lt.s32.totalorder %s160_s0, 2  ;;  %v69_v2 = vunpack.c.l.s4 %v118_v1  ;;  %v30_v29 = vld [vmem:[%s162_s1] sm:$0xff]  ;;  %v31_v33 = vld [vmem:[%s162_s1 + $0x8] sm:$0xff] }
   0x2   :  { %v35_v3 = vshrl.u32 %v34_v0, 7 }
   0x3   :  { %s165_s0 = smov (!%p25_p0, %s160_s0), 2  ;;  %v70_v4 = vunpack.c.0.s8 %v69_v2 }
   0x4   :  { %v36_v5 = vsub.s32 0, %v35_v3  ;;  %v40_v6 = vsub.s32 1, %v35_v3  ;;  %v44_v7 = vsub.s32 2, %v35_v3  ;;  %v48_v8 = vsub.s32 3, %v35_v3  ;;  %s116_s16 = sshll.u32 %s165_s0, 3 }
   0x5   :  { %v52_v9 = vsub.s32 4, %v35_v3  ;;  %v56_v10 = vsub.s32 5, %v35_v3  ;;  %v60_v11 = vsub.s32 6, %v35_v3  ;;  %s28_s19 = scalar_lea.vmem %s161_s2, %s116_s16  ;;  %v64_v12 = vsub.s32 7, %v35_v3 }
   0x6   :  { %v32_v13 = vld [vmem:[%s28_s19] sm:$0xff]  ;;  %v73_v14 = vsub.s32 %v70_v4, %v35_v3 }
   0x7   :  { %v37_v15 = vrot.slane %v32_v13, %v36_v5  ;;  %v41_v16 = vrot.slane %v32_v13, %v40_v6  ;;  %v45_v17 = vrot.slane %v32_v13, %v44_v7  ;;  %v49_v18 = vrot.slane %v32_v13, %v48_v8 }
   0x8   :  { %v53_v19 = vrot.slane %v32_v13, %v52_v9  ;;  %v57_v20 = vrot.slane %v32_v13, %v56_v10  ;;  %v61_v21 = vrot.slane %v32_v13, %v60_v11  ;;  %v65_v22 = vrot.slane %v32_v13, %v64_v12 }
   0x9   :  { %v66_v23 = vcombine.low %v37_v15, %v41_v16  ;;  %v67_v24 = vcombine.low %v45_v17, %v49_v18 }
   0xa   :  { %v83_v25 = vcombine.low %v53_v19, %v57_v20  ;;  %v84_v26 = vcombine.low %v61_v21, %v65_v22 }
   0xb   :  { %v74_v27 = vrot.slane %v66_v23, %v73_v14  ;;  %v81_v28 = vrot.slane %v67_v24, %v73_v14 }
   0xc   :  { %v91_v30 = vrot.slane %v83_v25, %v73_v14  ;;  %v98_v31 = vrot.slane %v84_v26, %v73_v14 }
   0xd   :  { %v82_v32 = vcombine.low %v74_v27, %v81_v28 }
   0xe   :  { %v99_v34 = vcombine.low %v91_v30, %v98_v31 }
   0xf   :  { %v102_v35 = vadd.f32 %v82_v32, %v30_v29 }
  0x10   :  { %v103_v36 = vadd.f32 %v99_v34, %v31_v33 }
  0x11   :  { %104 = vst [vmem:[%s163_s3] sm:$0xff] %v102_v35 }
  0x12   :  { %105 = vst [vmem:[%s163_s3 + $0x8] sm:$0xff] %v103_v36 }

</bundles_post_ra>
